<compile_context>
chip_gen: v7x
topology: tpu7x:2x2x1
jax: 0.10.0
libtpu: 0.0.40
codegen_flags: <defaults>
</compile_context>

<pallas_src>
import functools
import math

import jax
import jax.numpy as jnp
from jax import lax
from jax.experimental import pallas as pl
from jax.experimental.pallas import tpu as pltpu


def _mha_kernel(num_heads, dim_head, dim_model, q_tile,
                x_ref, wq_ref, bq_ref, wkv_ref, bkv_ref, wo_ref, bo_ref,
                o_ref, kv_ref):
    D = dim_model
    qi = pl.program_id(1)

    # ---- K|V projection: once per batch element (qi == 0), cached in VMEM ----
    @pl.when(qi == 0)
    def _():
        x_kv = x_ref[0]                                                  # (T, D) bf16
        kv = jnp.dot(x_kv, wkv_ref[...],
                     preferred_element_type=jnp.float32) + bkv_ref[...]  # (T, 2D) f32
        kv_ref[...] = kv.astype(jnp.bfloat16)

    # ---- Q projection for this query tile, sliced from the resident (T, D) block ----
    row0 = pl.multiple_of(qi * q_tile, q_tile)
    x_q = x_ref[0, pl.ds(row0, q_tile), :]                               # (tq, D) bf16
    # 1/sqrt(dim_head) is already folded into wq / bq on the host.
    q = (jnp.dot(x_q, wq_ref[...], preferred_element_type=jnp.float32)
         + bq_ref[...]).astype(jnp.bfloat16)                             # (tq, D)

    wo = wo_ref[...]                                                     # (D, D) bf16

    # ---- per-head attention; output projection fused into the head loop ----
    # acc is a lane-dense (tq, D) f32 accumulator: no masked column-slice stores.
    acc = jnp.zeros((q_tile, D), jnp.float32)
    for h in range(num_heads):
        lo = h * dim_head
        hi = lo + dim_head
        q_h = q[:, lo:hi]                                                # (tq, dh) bf16
        k_h = kv_ref[:, lo:hi]                                           # (T,  dh) bf16
        v_h = kv_ref[:, D + lo:D + hi]                                   # (T,  dh) bf16

        # scores = q_h @ k_h^T (contract on dh; no explicit transpose materialized)
        s = lax.dot_general(q_h, k_h, (((1,), (1,)), ((), ())),
                            preferred_element_type=jnp.float32)          # (tq, T)

        # numerically stable softmax; divide goes to the EUP (approx reciprocal,
        # relative error ~1e-3 -- acceptable for inference, see tolerance below).
        m = jnp.max(s, axis=-1, keepdims=True)
        e = jnp.exp(s - m)
        denom = jnp.sum(e, axis=-1, keepdims=True)
        p = (e * pl.reciprocal(denom, approx=True)).astype(jnp.bfloat16)

        # TODO(synk): optional position mask / attention-map dropout / decode-time
        # `hidden` KV cache of forwardQKV are not implemented (mask=None, eval).

        o_h = jnp.dot(p, v_h, preferred_element_type=jnp.float32)        # (tq, dh)
        acc = acc + jnp.dot(o_h.astype(jnp.bfloat16), wo[lo:hi, :],
                            preferred_element_type=jnp.float32)          # (tq, D)

    o_ref[0] = (acc + bo_ref[...]).astype(o_ref.dtype)


def multi_head_attention(x, params, num_heads, q_tile=256):
    """x: (B, T, D) float32.  params: dict of wq,bq,wk,bk,wv,bv,wo,bo (f32)."""
    B, T, D = x.shape
    assert D % num_heads == 0, "dim_model must be divisible by num_heads"
    dim_head = D // num_heads
    tq = min(q_tile, T)
    assert T % tq == 0, "sequence length must be divisible by the query tile"
    n_q_tiles = T // tq
    scale = 1.0 / math.sqrt(dim_head)

    # Activations and MXU weight operands in bf16; 1/sqrt(dh) folded into wq/bq.
    x_bf = x.astype(jnp.bfloat16)
    wq = (params["wq"] * scale).astype(jnp.bfloat16)
    bq = params["bq"] * scale                                            # (1, D)  f32
    wkv = jnp.concatenate([params["wk"], params["wv"]], axis=1).astype(jnp.bfloat16)
    bkv = jnp.concatenate([params["bk"], params["bv"]], axis=1)          # (1, 2D) f32
    wo = params["wo"].astype(jnp.bfloat16)
    bo = params["bo"]                                                    # (1, D)  f32

    # VMEM budget: ~7/8 of physical per-core VMEM (112 MiB on v5e/v6e, 56 MiB on v7x).
    try:
        vmem_cap = pltpu.get_tpu_info().vmem_capacity_bytes
    except Exception:
        vmem_cap = 64 * 1024 * 1024
    vmem_limit = int(vmem_cap * 7 // 8)

    kernel = functools.partial(_mha_kernel, num_heads, dim_head, D, tq)

    # Weights/biases are grid-invariant: constant index map + single buffering.
    const2 = lambda b, qi: (0, 0)
    single = pl.Buffered(buffer_count=1)

    # NOTE: for D < 128 (demo shapes) the output stores are lane-masked; production
    # D (multiple of 128) gives lane-dense stores automatically.
    return pl.pallas_call(
        kernel,
        out_shape=jax.ShapeDtypeStruct((B, T, D), x.dtype),
        grid_spec=pltpu.PrefetchScalarGridSpec(
            num_scalar_prefetch=0,
            grid=(B, n_q_tiles),
            in_specs=[
                # x: the full (T, D) row block of batch b; query tiles are sliced
                # from it in-kernel, so x is DMA'd from HBM only once per batch.
                pl.BlockSpec((1, T, D), lambda b, qi: (b, 0, 0)),
                pl.BlockSpec((D, D), const2, pipeline_mode=single),          # wq (scaled)
                pl.BlockSpec((1, D), const2, pipeline_mode=single),          # bq (scaled)
                pl.BlockSpec((D, 2 * D), const2, pipeline_mode=single),      # wk|wv fused
                pl.BlockSpec((1, 2 * D), const2, pipeline_mode=single),      # bk|bv fused
                pl.BlockSpec((D, D), const2, pipeline_mode=single),          # wo
                pl.BlockSpec((1, D), const2, pipeline_mode=single),          # bo
            ],
            out_specs=pl.BlockSpec((1, tq, D), lambda b, qi: (b, qi, 0)),
            scratch_shapes=[
                pltpu.VMEM((T, 2 * D), jnp.bfloat16),    # per-batch K|V cache
            ],
        ),
        compiler_params=pltpu.CompilerParams(
            dimension_semantics=("parallel", "arbitrary"),
            vmem_limit_bytes=vmem_limit,
        ),
    )(x_bf, wq, bq, wkv, bkv, wo, bo)


def init_params(key, dim_model, dim_kv=None):
    """Deterministic 'scaled_uniform'-style init (U[-1/sqrt(fan_in), 1/sqrt(fan_in)]),
    biases zero. Weights stored as (in_dim, out_dim)."""
    if dim_kv is None:
        dim_kv = dim_model
    ks = jax.random.split(key, 4)

    def lin(k, fan_in, fan_out):
        bound = 1.0 / math.sqrt(fan_in)
        w = jax.random.uniform(k, (fan_in, fan_out), jnp.float32, -bound, bound)
        b = jnp.zeros((1, fan_out), jnp.float32)
        return w, b

    wq, bq = lin(ks[0], dim_model, dim_model)
    wk, bk = lin(ks[1], dim_kv, dim_model)
    wv, bv = lin(ks[2], dim_kv, dim_model)
    wo, bo = lin(ks[3], dim_model, dim_model)
    return dict(wq=wq, bq=bq, wk=wk, bk=bk, wv=wv, bv=bv, wo=wo, bo=bo)


def reference_mha(x, params, num_heads):
    """Pure-JAX f32 reference mirroring the PyTorch forward exactly."""
    B, T, D = x.shape
    dh = D // num_heads
    q = x @ params["wq"] + params["bq"][0]
    k = x @ params["wk"] + params["bk"][0]
    v = x @ params["wv"] + params["bv"][0]
    q = q.reshape(B, T, num_heads, dh).transpose(0, 2, 1, 3)
    k = k.reshape(B, T, num_heads, dh).transpose(0, 2, 1, 3)
    v = v.reshape(B, T, num_heads, dh).transpose(0, 2, 1, 3)
    scores = jnp.einsum('bhtd,bhsd->bhts', q, k) / math.sqrt(dh)
    att_w = jax.nn.softmax(scores, axis=-1)
    o = jnp.einsum('bhts,bhsd->bhtd', att_w, v)
    o = o.transpose(0, 2, 1, 3).reshape(B, T, D)
    return o @ params["wo"] + params["bo"][0]


if __name__ == "__main__":
    # Small shapes consistent with forward(x): self-attention on (B, T, D)
    B, T, D = 2, 8, 32
    num_heads = 4

    key = jax.random.PRNGKey(0)
    kx, kp = jax.random.split(key)
    x = jax.random.normal(kx, (B, T, D), jnp.float32)
    params = init_params(kp, D)

    out = multi_head_attention(x, params, num_heads)
    out = jax.block_until_ready(out)

    ref = reference_mha(x, params, num_heads)
    assert out.shape == (B, T, D)
    # bf16 activations/weights on the MXU (f32 accumulation) + EUP approx reciprocal
    # in the softmax -> looser tolerance than a pure-f32 kernel.
    assert jnp.allclose(out, ref, atol=5e-2, rtol=5e-2), "mismatch vs JAX reference"

    print("KERNEL_OK")
</pallas_src>

<mosaic_0001>
module attributes {stable_mosaic.version = 11 : i64} {
  func.func @_mha_kernel(%arg0: i32, %arg1: i32, %arg2: memref<1x8x32xbf16, #tpu.memory_space<vmem>>, %arg3: memref<32x32xbf16, #tpu.memory_space<vmem>>, %arg4: memref<1x32xf32, #tpu.memory_space<vmem>>, %arg5: memref<32x64xbf16, #tpu.memory_space<vmem>>, %arg6: memref<1x64xf32, #tpu.memory_space<vmem>>, %arg7: memref<32x32xbf16, #tpu.memory_space<vmem>>, %arg8: memref<1x32xf32, #tpu.memory_space<vmem>>, %arg9: memref<1x8x32xf32, #tpu.memory_space<vmem>>, %arg10: memref<8x64xbf16, #tpu.memory_space<vmem>>) attributes {dimension_semantics = [#tpu.dimension_semantics<parallel>, #tpu.dimension_semantics<arbitrary>], iteration_bounds = array<i64: 2, 1>, scalar_prefetch = 0 : i64, scratch_operands = 1 : i64, tpu.core_type = #tpu.core_type<tc>, window_params = [{transform_indices = @transform_0, window_bounds = array<i64: 1, 8, 32>}, {pipeline_mode = #tpu.pipeline_mode<synchronous>, transform_indices = @transform_1, window_bounds = array<i64: 32, 32>}, {pipeline_mode = #tpu.pipeline_mode<synchronous>, transform_indices = @transform_2, window_bounds = array<i64: 1, 32>}, {pipeline_mode = #tpu.pipeline_mode<synchronous>, transform_indices = @transform_3, window_bounds = array<i64: 32, 64>}, {pipeline_mode = #tpu.pipeline_mode<synchronous>, transform_indices = @transform_4, window_bounds = array<i64: 1, 64>}, {pipeline_mode = #tpu.pipeline_mode<synchronous>, transform_indices = @transform_5, window_bounds = array<i64: 32, 32>}, {pipeline_mode = #tpu.pipeline_mode<synchronous>, transform_indices = @transform_6, window_bounds = array<i64: 1, 32>}, {transform_indices = @transform_7, window_bounds = array<i64: 1, 8, 32>}]} {
    %c0_i32 = arith.constant 0 : i32
    %0 = arith.cmpi eq, %arg1, %c0_i32 : i32
    %1 = arith.extui %0 : i1 to i32
    %c0_i32_0 = arith.constant 0 : i32
    %2 = arith.cmpi ne, %1, %c0_i32_0 : i32
    scf.if %2 {
      %c0_43 = arith.constant 0 : index
      %c0_44 = arith.constant 0 : index
      %c0_45 = arith.constant 0 : index
      %102 = vector.load %arg2[%c0_43, %c0_44, %c0_45] : memref<1x8x32xbf16, #tpu.memory_space<vmem>>, vector<1x8x32xbf16>
      %103 = vector.shape_cast %102 : vector<1x8x32xbf16> to vector<8x32xbf16>
      %c0_46 = arith.constant 0 : index
      %c0_47 = arith.constant 0 : index
      %104 = vector.load %arg5[%c0_46, %c0_47] : memref<32x64xbf16, #tpu.memory_space<vmem>>, vector<32x64xbf16>
      %cst_48 = arith.constant dense<0.000000e+00> : vector<8x64xf32>
      %105 = tpu.matmul %103, %104, %cst_48 {dimension_numbers = #tpu.dot_dimension_numbers<[1], [0], [0], [1], [0, 0, 1, 1], [], []>} : vector<8x32xbf16>, vector<32x64xbf16>, vector<8x64xf32> -> vector<8x64xf32>
      %c0_49 = arith.constant 0 : index
      %c0_50 = arith.constant 0 : index
      %106 = vector.load %arg6[%c0_49, %c0_50] : memref<1x64xf32, #tpu.memory_space<vmem>>, vector<1x64xf32>
      %107 = vector.broadcast %106 : vector<1x64xf32> to vector<8x64xf32>
      %108 = arith.addf %105, %107 : vector<8x64xf32>
      %109 = arith.truncf %108 : vector<8x64xf32> to vector<8x64xbf16>
      %c0_51 = arith.constant 0 : index
      %c0_52 = arith.constant 0 : index
      %110 = vector.load %arg10[%c0_51, %c0_52] : memref<8x64xbf16, #tpu.memory_space<vmem>>, vector<8x64xbf16>
      tpu.vector_store %arg10[%c0_51, %c0_52], %109 {strides = array<i32>} : memref<8x64xbf16, #tpu.memory_space<vmem>>, vector<8x64xbf16>,
    } else {
    }
    %c8_i32 = arith.constant 8 : i32
    %3 = arith.muli %arg1, %c8_i32 : i32
    %4 = tpu.assume_multiple %3, 8 : i32
    %c0 = arith.constant 0 : index
    %5 = arith.index_cast %4 : i32 to index
    %c0_1 = arith.constant 0 : index
    %6 = vector.load %arg2[%c0, %5, %c0_1] : memref<1x8x32xbf16, #tpu.memory_space<vmem>>, vector<1x8x32xbf16>
    %7 = vector.shape_cast %6 : vector<1x8x32xbf16> to vector<8x32xbf16>
    %c0_2 = arith.constant 0 : index
    %c0_3 = arith.constant 0 : index
    %8 = vector.load %arg3[%c0_2, %c0_3] : memref<32x32xbf16, #tpu.memory_space<vmem>>, vector<32x32xbf16>
    %cst = arith.constant dense<0.000000e+00> : vector<8x32xf32>
    %9 = tpu.matmul %7, %8, %cst {dimension_numbers = #tpu.dot_dimension_numbers<[1], [0], [0], [1], [0, 0, 1, 1], [], []>} : vector<8x32xbf16>, vector<32x32xbf16>, vector<8x32xf32> -> vector<8x32xf32>
    %c0_4 = arith.constant 0 : index
    %c0_5 = arith.constant 0 : index
    %10 = vector.load %arg4[%c0_4, %c0_5] : memref<1x32xf32, #tpu.memory_space<vmem>>, vector<1x32xf32>
    %11 = vector.broadcast %10 : vector<1x32xf32> to vector<8x32xf32>
    %12 = arith.addf %9, %11 : vector<8x32xf32>
    %13 = arith.truncf %12 : vector<8x32xf32> to vector<8x32xbf16>
    %c0_6 = arith.constant 0 : index
    %c0_7 = arith.constant 0 : index
    %14 = vector.load %arg7[%c0_6, %c0_7] : memref<32x32xbf16, #tpu.memory_space<vmem>>, vector<32x32xbf16>
    %cst_8 = arith.constant 0.000000e+00 : f32
    %15 = vector.broadcast %cst_8 : f32 to vector<8x32xf32>
    %16 = vector.extract_strided_slice %13 {offsets = [0, 0], sizes = [8, 8], strides = [1, 1]} : vector<8x32xbf16> to vector<8x8xbf16>
    %c0_9 = arith.constant 0 : index
    %c0_10 = arith.constant 0 : index
    %17 = vector.load %arg10[%c0_9, %c0_10] : memref<8x64xbf16, #tpu.memory_space<vmem>>, vector<8x8xbf16>
    %c0_11 = arith.constant 0 : index
    %c32 = arith.constant 32 : index
    %18 = vector.load %arg10[%c0_11, %c32] : memref<8x64xbf16, #tpu.memory_space<vmem>>, vector<8x8xbf16>
    %cst_12 = arith.constant dense<0.000000e+00> : vector<8x8xf32>
    %19 = tpu.matmul %16, %17, %cst_12 {dimension_numbers = #tpu.dot_dimension_numbers<[1], [1], [0], [0], [0, 0, 1, 0], [], []>} : vector<8x8xbf16>, vector<8x8xbf16>, vector<8x8xf32> -> vector<8x8xf32>
    %cst_13 = arith.constant dense<0xFF800000> : vector<8xf32>
    %20 = vector.multi_reduction <maximumf>, %19, %cst_13 [1] : vector<8x8xf32> to vector<8xf32>
    %21 = vector.shape_cast %20 : vector<8xf32> to vector<8x1xf32>
    %22 = vector.broadcast %21 : vector<8x1xf32> to vector<8x8xf32>
    %23 = arith.subf %19, %22 : vector<8x8xf32>
    %24 = math.exp %23 : vector<8x8xf32>
    %cst_14 = arith.constant dense<0.000000e+00> : vector<8xf32>
    %25 = vector.multi_reduction <add>, %24, %cst_14 [1] : vector<8x8xf32> to vector<8xf32>
    %26 = vector.shape_cast %25 : vector<8xf32> to vector<8x1xf32>
    %27 = tpu.reciprocal %26 {approx = true} : vector<8x1xf32> -> vector<8x1xf32>
    %28 = vector.broadcast %27 : vector<8x1xf32> to vector<8x8xf32>
    %29 = arith.mulf %24, %28 : vector<8x8xf32>
    %30 = arith.truncf %29 : vector<8x8xf32> to vector<8x8xbf16>
    %cst_15 = arith.constant dense<0.000000e+00> : vector<8x8xf32>
    %31 = tpu.matmul %30, %18, %cst_15 {dimension_numbers = #tpu.dot_dimension_numbers<[1], [0], [0], [1], [0, 0, 1, 1], [], []>} : vector<8x8xbf16>, vector<8x8xbf16>, vector<8x8xf32> -> vector<8x8xf32>
    %32 = arith.truncf %31 : vector<8x8xf32> to vector<8x8xbf16>
    %33 = vector.extract_strided_slice %14 {offsets = [0, 0], sizes = [8, 32], strides = [1, 1]} : vector<32x32xbf16> to vector<8x32xbf16>
    %cst_16 = arith.constant dense<0.000000e+00> : vector<8x32xf32>
    %34 = tpu.matmul %32, %33, %cst_16 {dimension_numbers = #tpu.dot_dimension_numbers<[1], [0], [0], [1], [0, 0, 1, 1], [], []>} : vector<8x8xbf16>, vector<8x32xbf16>, vector<8x32xf32> -> vector<8x32xf32>
    %35 = arith.addf %15, %34 : vector<8x32xf32>
    %36 = vector.extract_strided_slice %13 {offsets = [0, 8], sizes = [8, 8], strides = [1, 1]} : vector<8x32xbf16> to vector<8x8xbf16>
    %c0_17 = arith.constant 0 : index
    %c8 = arith.constant 8 : index
    %37 = vector.load %arg10[%c0_17, %c8] : memref<8x64xbf16, #tpu.memory_space<vmem>>, vector<8x8xbf16>
    %c0_18 = arith.constant 0 : index
    %c40 = arith.constant 40 : index
    %38 = vector.load %arg10[%c0_18, %c40] : memref<8x64xbf16, #tpu.memory_space<vmem>>, vector<8x8xbf16>
    %cst_19 = arith.constant dense<0.000000e+00> : vector<8x8xf32>
    %39 = tpu.matmul %36, %37, %cst_19 {dimension_numbers = #tpu.dot_dimension_numbers<[1], [1], [0], [0], [0, 0, 1, 0], [], []>} : vector<8x8xbf16>, vector<8x8xbf16>, vector<8x8xf32> -> vector<8x8xf32>
    %cst_20 = arith.constant dense<0xFF800000> : vector<8xf32>
    %40 = vector.multi_reduction <maximumf>, %39, %cst_20 [1] : vector<8x8xf32> to vector<8xf32>
    %41 = vector.shape_cast %40 : vector<8xf32> to vector<8x1xf32>
    %42 = vector.broadcast %41 : vector<8x1xf32> to vector<8x8xf32>
    %43 = arith.subf %39, %42 : vector<8x8xf32>
    %44 = math.exp %43 : vector<8x8xf32>
    %cst_21 = arith.constant dense<0.000000e+00> : vector<8xf32>
    %45 = vector.multi_reduction <add>, %44, %cst_21 [1] : vector<8x8xf32> to vector<8xf32>
    %46 = vector.shape_cast %45 : vector<8xf32> to vector<8x1xf32>
    %47 = tpu.reciprocal %46 {approx = true} : vector<8x1xf32> -> vector<8x1xf32>
    %48 = vector.broadcast %47 : vector<8x1xf32> to vector<8x8xf32>
    %49 = arith.mulf %44, %48 : vector<8x8xf32>
    %50 = arith.truncf %49 : vector<8x8xf32> to vector<8x8xbf16>
    %cst_22 = arith.constant dense<0.000000e+00> : vector<8x8xf32>
    %51 = tpu.matmul %50, %38, %cst_22 {dimension_numbers = #tpu.dot_dimension_numbers<[1], [0], [0], [1], [0, 0, 1, 1], [], []>} : vector<8x8xbf16>, vector<8x8xbf16>, vector<8x8xf32> -> vector<8x8xf32>
    %52 = arith.truncf %51 : vector<8x8xf32> to vector<8x8xbf16>
    %53 = vector.extract_strided_slice %14 {offsets = [8, 0], sizes = [8, 32], strides = [1, 1]} : vector<32x32xbf16> to vector<8x32xbf16>
    %cst_23 = arith.constant dense<0.000000e+00> : vector<8x32xf32>
    %54 = tpu.matmul %52, %53, %cst_23 {dimension_numbers = #tpu.dot_dimension_numbers<[1], [0], [0], [1], [0, 0, 1, 1], [], []>} : vector<8x8xbf16>, vector<8x32xbf16>, vector<8x32xf32> -> vector<8x32xf32>
    %55 = arith.addf %35, %54 : vector<8x32xf32>
    %56 = vector.extract_strided_slice %13 {offsets = [0, 16], sizes = [8, 8], strides = [1, 1]} : vector<8x32xbf16> to vector<8x8xbf16>
    %c0_24 = arith.constant 0 : index
    %c16 = arith.constant 16 : index
    %57 = vector.load %arg10[%c0_24, %c16] : memref<8x64xbf16, #tpu.memory_space<vmem>>, vector<8x8xbf16>
    %c0_25 = arith.constant 0 : index
    %c48 = arith.constant 48 : index
    %58 = vector.load %arg10[%c0_25, %c48] : memref<8x64xbf16, #tpu.memory_space<vmem>>, vector<8x8xbf16>
    %cst_26 = arith.constant dense<0.000000e+00> : vector<8x8xf32>
    %59 = tpu.matmul %56, %57, %cst_26 {dimension_numbers = #tpu.dot_dimension_numbers<[1], [1], [0], [0], [0, 0, 1, 0], [], []>} : vector<8x8xbf16>, vector<8x8xbf16>, vector<8x8xf32> -> vector<8x8xf32>
    %cst_27 = arith.constant dense<0xFF800000> : vector<8xf32>
    %60 = vector.multi_reduction <maximumf>, %59, %cst_27 [1] : vector<8x8xf32> to vector<8xf32>
    %61 = vector.shape_cast %60 : vector<8xf32> to vector<8x1xf32>
    %62 = vector.broadcast %61 : vector<8x1xf32> to vector<8x8xf32>
    %63 = arith.subf %59, %62 : vector<8x8xf32>
    %64 = math.exp %63 : vector<8x8xf32>
    %cst_28 = arith.constant dense<0.000000e+00> : vector<8xf32>
    %65 = vector.multi_reduction <add>, %64, %cst_28 [1] : vector<8x8xf32> to vector<8xf32>
    %66 = vector.shape_cast %65 : vector<8xf32> to vector<8x1xf32>
    %67 = tpu.reciprocal %66 {approx = true} : vector<8x1xf32> -> vector<8x1xf32>
    %68 = vector.broadcast %67 : vector<8x1xf32> to vector<8x8xf32>
    %69 = arith.mulf %64, %68 : vector<8x8xf32>
    %70 = arith.truncf %69 : vector<8x8xf32> to vector<8x8xbf16>
    %cst_29 = arith.constant dense<0.000000e+00> : vector<8x8xf32>
    %71 = tpu.matmul %70, %58, %cst_29 {dimension_numbers = #tpu.dot_dimension_numbers<[1], [0], [0], [1], [0, 0, 1, 1], [], []>} : vector<8x8xbf16>, vector<8x8xbf16>, vector<8x8xf32> -> vector<8x8xf32>
    %72 = arith.truncf %71 : vector<8x8xf32> to vector<8x8xbf16>
    %73 = vector.extract_strided_slice %14 {offsets = [16, 0], sizes = [8, 32], strides = [1, 1]} : vector<32x32xbf16> to vector<8x32xbf16>
    %cst_30 = arith.constant dense<0.000000e+00> : vector<8x32xf32>
    %74 = tpu.matmul %72, %73, %cst_30 {dimension_numbers = #tpu.dot_dimension_numbers<[1], [0], [0], [1], [0, 0, 1, 1], [], []>} : vector<8x8xbf16>, vector<8x32xbf16>, vector<8x32xf32> -> vector<8x32xf32>
    %75 = arith.addf %55, %74 : vector<8x32xf32>
    %76 = vector.extract_strided_slice %13 {offsets = [0, 24], sizes = [8, 8], strides = [1, 1]} : vector<8x32xbf16> to vector<8x8xbf16>
    %c0_31 = arith.constant 0 : index
    %c24 = arith.constant 24 : index
    %77 = vector.load %arg10[%c0_31, %c24] : memref<8x64xbf16, #tpu.memory_space<vmem>>, vector<8x8xbf16>
    %c0_32 = arith.constant 0 : index
    %c56 = arith.constant 56 : index
    %78 = vector.load %arg10[%c0_32, %c56] : memref<8x64xbf16, #tpu.memory_space<vmem>>, vector<8x8xbf16>
    %cst_33 = arith.constant dense<0.000000e+00> : vector<8x8xf32>
    %79 = tpu.matmul %76, %77, %cst_33 {dimension_numbers = #tpu.dot_dimension_numbers<[1], [1], [0], [0], [0, 0, 1, 0], [], []>} : vector<8x8xbf16>, vector<8x8xbf16>, vector<8x8xf32> -> vector<8x8xf32>
    %cst_34 = arith.constant dense<0xFF800000> : vector<8xf32>
    %80 = vector.multi_reduction <maximumf>, %79, %cst_34 [1] : vector<8x8xf32> to vector<8xf32>
    %81 = vector.shape_cast %80 : vector<8xf32> to vector<8x1xf32>
    %82 = vector.broadcast %81 : vector<8x1xf32> to vector<8x8xf32>
    %83 = arith.subf %79, %82 : vector<8x8xf32>
    %84 = math.exp %83 : vector<8x8xf32>
    %cst_35 = arith.constant dense<0.000000e+00> : vector<8xf32>
    %85 = vector.multi_reduction <add>, %84, %cst_35 [1] : vector<8x8xf32> to vector<8xf32>
    %86 = vector.shape_cast %85 : vector<8xf32> to vector<8x1xf32>
    %87 = tpu.reciprocal %86 {approx = true} : vector<8x1xf32> -> vector<8x1xf32>
    %88 = vector.broadcast %87 : vector<8x1xf32> to vector<8x8xf32>
    %89 = arith.mulf %84, %88 : vector<8x8xf32>
    %90 = arith.truncf %89 : vector<8x8xf32> to vector<8x8xbf16>
    %cst_36 = arith.constant dense<0.000000e+00> : vector<8x8xf32>
    %91 = tpu.matmul %90, %78, %cst_36 {dimension_numbers = #tpu.dot_dimension_numbers<[1], [0], [0], [1], [0, 0, 1, 1], [], []>} : vector<8x8xbf16>, vector<8x8xbf16>, vector<8x8xf32> -> vector<8x8xf32>
    %92 = arith.truncf %91 : vector<8x8xf32> to vector<8x8xbf16>
    %93 = vector.extract_strided_slice %14 {offsets = [24, 0], sizes = [8, 32], strides = [1, 1]} : vector<32x32xbf16> to vector<8x32xbf16>
    %cst_37 = arith.constant dense<0.000000e+00> : vector<8x32xf32>
    %94 = tpu.matmul %92, %93, %cst_37 {dimension_numbers = #tpu.dot_dimension_numbers<[1], [0], [0], [1], [0, 0, 1, 1], [], []>} : vector<8x8xbf16>, vector<8x32xbf16>, vector<8x32xf32> -> vector<8x32xf32>
    %95 = arith.addf %75, %94 : vector<8x32xf32>
    %c0_38 = arith.constant 0 : index
    %c0_39 = arith.constant 0 : index
    %96 = vector.load %arg8[%c0_38, %c0_39] : memref<1x32xf32, #tpu.memory_space<vmem>>, vector<1x32xf32>
    %97 = vector.broadcast %96 : vector<1x32xf32> to vector<8x32xf32>
    %98 = arith.addf %95, %97 : vector<8x32xf32>
    %c0_40 = arith.constant 0 : index
    %c0_41 = arith.constant 0 : index
    %c0_42 = arith.constant 0 : index
    %99 = vector.load %arg9[%c0_40, %c0_41, %c0_42] : memref<1x8x32xf32, #tpu.memory_space<vmem>>, vector<1x8x32xf32>
    %100 = vector.shape_cast %99 : vector<1x8x32xf32> to vector<8x32xf32>
    %101 = vector.shape_cast %98 : vector<8x32xf32> to vector<1x8x32xf32>
    tpu.vector_store %arg9[%c0_40, %c0_41, %c0_42], %101 {strides = array<i32>} : memref<1x8x32xf32, #tpu.memory_space<vmem>>, vector<1x8x32xf32>,
    return
  }
  func.func @transform_0(%arg0: i32, %arg1: i32) -> (i32, i32, i32) {
    %c0_i32 = arith.constant 0 : i32
    %c0_i32_0 = arith.constant 0 : i32
    %c0_i32_1 = arith.constant 0 : i32
    return %arg0, %c0_i32, %c0_i32_0 : i32, i32, i32
  }
  func.func @transform_1(%arg0: i32, %arg1: i32) -> (i32, i32) {
    %c0_i32 = arith.constant 0 : i32
    %c0_i32_0 = arith.constant 0 : i32
    %c0_i32_1 = arith.constant 0 : i32
    return %c0_i32, %c0_i32_0 : i32, i32
  }
  func.func @transform_2(%arg0: i32, %arg1: i32) -> (i32, i32) {
    %c0_i32 = arith.constant 0 : i32
    %c0_i32_0 = arith.constant 0 : i32
    %c0_i32_1 = arith.constant 0 : i32
    return %c0_i32, %c0_i32_0 : i32, i32
  }
  func.func @transform_3(%arg0: i32, %arg1: i32) -> (i32, i32) {
    %c0_i32 = arith.constant 0 : i32
    %c0_i32_0 = arith.constant 0 : i32
    %c0_i32_1 = arith.constant 0 : i32
    return %c0_i32, %c0_i32_0 : i32, i32
  }
  func.func @transform_4(%arg0: i32, %arg1: i32) -> (i32, i32) {
    %c0_i32 = arith.constant 0 : i32
    %c0_i32_0 = arith.constant 0 : i32
    %c0_i32_1 = arith.constant 0 : i32
    return %c0_i32, %c0_i32_0 : i32, i32
  }
  func.func @transform_5(%arg0: i32, %arg1: i32) -> (i32, i32) {
    %c0_i32 = arith.constant 0 : i32
    %c0_i32_0 = arith.constant 0 : i32
    %c0_i32_1 = arith.constant 0 : i32
    return %c0_i32, %c0_i32_0 : i32, i32
  }
  func.func @transform_6(%arg0: i32, %arg1: i32) -> (i32, i32) {
    %c0_i32 = arith.constant 0 : i32
    %c0_i32_0 = arith.constant 0 : i32
    %c0_i32_1 = arith.constant 0 : i32
    return %c0_i32, %c0_i32_0 : i32, i32
  }
  func.func @transform_7(%arg0: i32, %arg1: i32) -> (i32, i32, i32) {
    %c0_i32 = arith.constant 0 : i32
    %c0_i32_0 = arith.constant 0 : i32
    return %arg0, %arg1, %c0_i32 : i32, i32, i32
  }
}

</mosaic_0001>

<bundles_post_ra>
// kernel: tpu_custom_call.1
= control target key start
LH: loop header
LB: loop body
LE: loop exit
PB: predicated region body
PF: predicated region fallthrough
CT: control target
= control target key end

     0   :  { %12 = vsyncpa [#allocation4], 0  ;;  %s2118_s0 = inlined_call_operand.hbm [shape: bf16[2,8,32], index: 0, kind: input, shape index: {}]   ;;  %s2119_s1 = inlined_call_operand.hbm [shape: bf16[32,32], index: 1, kind: input, shape index: {}]   ;;  %s2120_s2 = inlined_call_operand.vmem [shape: f32[1,32], index: 2, kind: input, shape index: {}]   ;;  %s2121_s3 = inlined_call_operand.hbm [shape: bf16[32,64], index: 3, kind: input, shape index: {}]   ;;  %s2122_s4 = inlined_call_operand.vmem [shape: f32[1,64], index: 4, kind: input, shape index: {}]   ;;  %s2123_s5 = inlined_call_operand.vmem [shape: bf16[32,32], index: 5, kind: input, shape index: {}]   ;;  %s2124_s6 = inlined_call_operand.vmem [shape: f32[1,32], index: 6, kind: input, shape index: {}]   ;;  %s2125_s7 = inlined_call_operand.hbm [shape: f32[2,8,32], index: 7, kind: output, shape index: {}]  }
   0x1   :  { %14 = vsyncpa [#allocation4 + $0x1], 0 }
   0x2   :  { %15 = vsyncpa [#allocation7], 0 }
   0x3   :  { %16 = vsyncpa [#allocation5], 0 }
   0x4   :  { %18 = vsyncpa [#allocation5 + $0x1], 0  ;;  %s1749_s24 = smov 0   ;;  %s1751_s25 = smov 0  }
   0x5   :  { %s1753_s26 = smov 0   ;;  %s1755_s27 = smov 0  }
   0x6   :  { %s1757_s28 = smov 0   ;;  %s1759_s29 = smov 0  }
   0x7 LB: > { %2132 = sst [smem:[#allocation13_spill]] %s1672_s24  ;;  %s1248_s30 = sadd.s32 4294967295, %s1692_s29   ;;  %s1692_s29 = sphi %s1759_s29, %s24_s29   ;;  %s1688_s28 = sphi %s1757_s28, %s2153_s28   ;;  %s1684_s27 = sphi %s1755_s27, %s2152_s27   ;;  %s1680_s26 = sphi %s1753_s26, %s2151_s26   ;;  %s1676_s25 = sphi %s1751_s25, %s2150_s25   ;;  %s1672_s24 = sphi %s1749_s24, %s2149_s24  }
   0x8   : > { %s1249_s8 = sadd.s32 4294967294, %s1692_s29   ;;  %p56_p0 = scmp.ne.s32.totalorder %s1676_s25, %s1672_s24 }
   0x9   : > { %p1783_p1 = scmp.eq.s32.totalorder %s1248_s30, 0  ;;  %p1787_p2 = scmp.eq.s32.totalorder %s1248_s30, 1 }
   0xa   : > { %p214_p3 = scmp.eq.s32.totalorder %s1249_s8, 1  ;;  %p1250_p5 = scmp.ge.s32.totalorder %s1692_s29, 1 }
   0xb   : > { %s2133_s9 = scalar_select %p1783_p1, 1, 0 }
   0xc   : > { %p1793_p4 = por %p1783_p1, %p56_p0  ;;  %p1798_p6 = por %p214_p3, %p56_p0 }
   0xd   : > { %p221_p7 = scmp.lt.s32.totalorder %s1692_s29, 3  ;;  %s1694_s14 = smov [#allocation6]  }
   0xe   : > { %s2135_s11 = scalar_select %p1793_p4, 1, 0 }
   0xf   : > { %s2136_s12 = scalar_select %p1798_p6, 1, 0 }
  0x10   : > { %p1803_p8 = pnand %p1250_p5, %p221_p7  ;;  %s233_s15 = sshll.u32 %s1694_s14, 4  ;;  %s1807_s15 = int_to_ptr.vmem [resolvable:$true] %s233_s15 }
  0x11   : > { %2137 = sst [smem:[#allocation14_spill]] %s2136_s12  ;;  %s1695_s17 = smov [#allocation8]  }
  0x12   : > { %p1417_p9 = pneg %p1803_p8  ;;  %s249_s18 = sshll.u32 %s1695_s17, 4  ;;  %s1818_s18 = int_to_ptr.vmem [resolvable:$true] %s249_s18 }
  0x13   : > { %s1520_s21 = scalar_lea.hbm %s2119_s1, 256 }
  0x14   : > { %p1814_p11 = pnand %p1417_p9, %p1783_p1  ;;  %p1521_p12 = scmp.ne.s32.totalorder %s2119_s1, %s1520_s21 }
  0x15   : > { %p1527_p5 = scmp.lt.u32.totalorder %s1520_s21, %s2119_s1 }
  0x16   : > { %p1522_p13 = pneg %p1814_p11 }
  0x18   : > { %p1523_p0 = pnand %p1522_p13, %p1521_p12 }
  0x1a   : > { %p1524_p3 = pneg %p1523_p0 }
  0x1c   : > { %p1529_p7 = pnand %p1527_p5, %p1524_p3 }
  0x1e   : > { %1532 = shalt.err (!%p1529_p7)
}
  0x1f   : > { %s1533_s14 = scalar_lea.vmem %s1807_s15, 256  ;;  %p1541_p1 = scmp.lt.s32.totalorder %s1807_s15, %s1807_s15 }
  0x20   : > { %p1534_p9 = scmp.ne.s32.totalorder %s1807_s15, %s1533_s14  ;;  %p1542_p12 = scmp.lt.s32.totalorder %s1533_s14, %s1533_s14 }
  0x22   : > { %p1536_p10 = pnand %p1534_p9, %p1522_p13  ;;  %p1543_p0 = por %p1542_p12, %p1541_p1 }
  0x24   : > { %p1537_p6 = pneg %p1536_p10 }
  0x26   : > { %p1544_p4 = pnand %p1543_p0, %p1537_p6 }
  0x28   : > { %1547 = shalt.err (!%p1544_p4)
}
  0x29   : > { %s1696_s17 = smov 64   ;;  %s1697_s19 = smov 4  }
  0x2a   : > { %1420 = dma.hbm_to_vmem [thread:$0]  (!%p1814_p11), %s2119_s1, 256, %s1807_s15, [#allocation7], %s1696_s17, %s1696_s17, %s1697_s19  }
  0x2b   : > { %s1548_s30 = scalar_lea.hbm %s2121_s3, 256 }
  0x2c   : > { %p1549_p1 = scmp.ne.s32.totalorder %s2121_s3, %s1548_s30  ;;  %p1555_p10 = scmp.lt.u32.totalorder %s1548_s30, %s2121_s3 }
  0x2e   : > { %p1551_p4 = pnand %p1549_p1, %p1522_p13 }
  0x30   : > { %p1552_p6 = pneg %p1551_p4 }
  0x32   : > { %p1557_p3 = pnand %p1555_p10, %p1552_p6 }
  0x34   : > { %1560 = shalt.err (!%p1557_p3)
}
  0x35   : > { %s1561_s15 = scalar_lea.vmem %s1818_s18, 256  ;;  %p1569_p12 = scmp.lt.s32.totalorder %s1818_s18, %s1818_s18 }
  0x36   : > { %p1562_p5 = scmp.ne.s32.totalorder %s1818_s18, %s1561_s15  ;;  %p1570_p0 = scmp.lt.s32.totalorder %s1561_s15, %s1561_s15 }
  0x38   : > { %p1564_p7 = pnand %p1562_p5, %p1522_p13  ;;  %p1571_p1 = por %p1570_p0, %p1569_p12 }
  0x3a   : > { %p1565_p9 = pneg %p1564_p7 }
  0x3c   : > { %p1572_p4 = pnand %p1571_p1, %p1565_p9 }
  0x3e   : > { %1575 = shalt.err (!%p1572_p4)
}
  0x3f   : > { %1423 = dma.hbm_to_vmem [thread:$0]  (!%p1814_p11), %s2121_s3, 256, %s1818_s18, [#allocation7], %s1696_s17, %s1696_s17, %s1697_s19  }
  0x40   : > { %s36_s20 = sadd.s32 1, %s1688_s28  ;;  %s43_s21 = sadd.s32 1, %s1680_s26 }
  0x41   : > { %p38_p13 = scmp.ge.s32.totalorder %s36_s20, 2  ;;  %p50_p6 = scmp.ne.s32.totalorder %s1680_s26, %s1676_s25 }
  0x42   : > { %p51_p10 = scmp.eq.s32.totalorder %s1692_s29, 0  ;;  %p1434_p3 = scmp.lt.s32.totalorder %s1692_s29, 2 }
  0x43   : > { %s2155_s20 = smov (%p38_p13, %s36_s20), 0  ;;  %p1882_p7 = por %p1787_p2, %p50_p6 }
  0x44   : > { %p52_p5 = por %p51_p10, %p50_p6  ;;  %s40_s22 = ssub.s32 %s1688_s28, %s2155_s20 }
  0x45   : > { %s2140_s16 = scalar_select %p1882_p7, 1, 0 }
  0x46   : > { %s272_s23 = sand.u32 1, %s1680_s26   ;;  %p41_p9 = scmp.eq.s32.totalorder %s40_s22, 0 }
  0x47   : > { %s1254_s18 = sshll.u32 %s272_s23, 2  ;;  %s1255_s17 = sshll.u32 %s1688_s28, 6 }
  0x48   : > { %s1891_s19 = scalar_select %p41_p9, %s1680_s26, %s43_s21  }
  0x49   : > { %s1896_s14 = scalar_lea.hbm %s2118_s0, %s1255_s17  ;;  %s276_s10 = scalar_lea.vmem [#allocation3], %s1254_s18 }
  0x4a   : > { %s283_s15 = sshll.u32 %s276_s10, 4  ;;  %p1900_p2 = pnand %p1434_p3, %p52_p5  ;;  %s1904_s15 = int_to_ptr.vmem [resolvable:$true] %s283_s15 }
  0x4b   : > { %s273_s12 = scalar_lea.sflag [#allocation4], %s272_s23  ;;  %s1576_s21 = scalar_lea.hbm %s1896_s14, 64 }
  0x4c   : > { %p1577_p11 = scmp.ne.s32.totalorder %s1896_s14, %s1576_s21  ;;  %p1578_p12 = pneg %p1900_p2 }
  0x4d   : > { %s1581_s17 = scalar_lea.hbm %s2118_s0, 128  ;;  %p1582_p4 = scmp.lt.u32.totalorder %s1896_s14, %s2118_s0 }
  0x4e   : > { %p1579_p0 = pnand %p1578_p12, %p1577_p11  ;;  %p1583_p13 = scmp.lt.u32.totalorder %s1581_s17, %s1576_s21 }
  0x4f   : > { %p1585_p10 = scmp.lt.u32.totalorder %s1576_s21, %s1896_s14 }
  0x50   : > { %p1580_p1 = pneg %p1579_p0  ;;  %p1584_p6 = por %p1583_p13, %p1582_p4 }
  0x52   : > { %p1586_p3 = por %p1585_p10, %p1584_p6 }
  0x54   : > { %p1587_p5 = pnand %p1586_p3, %p1580_p1 }
  0x56   : > { %1590 = shalt.err (!%p1587_p5)
}
  0x57   : > { %s1591_s23 = scalar_lea.vmem %s1904_s15, 64  ;;  %s1698_s10 = smov [#allocation3]  }
  0x58   : > { %p1592_p9 = scmp.ne.s32.totalorder %s1904_s15, %s1591_s23  ;;  %s1596_s22 = sshll.u32 %s1698_s10, 4  ;;  %s1597_s22 = int_to_ptr.vmem [resolvable:$false] %s1596_s22 }
  0x59   : > { %s1598_s18 = scalar_lea.vmem %s1597_s22, 128  ;;  %p1599_p7 = scmp.lt.s32.totalorder %s1904_s15, %s1597_s22 }
  0x5a   : > { %p1594_p11 = pnand %p1592_p9, %p1578_p12  ;;  %p1600_p4 = scmp.lt.s32.totalorder %s1598_s18, %s1591_s23 }
  0x5c   : > { %p1595_p0 = pneg %p1594_p11  ;;  %p1601_p13 = por %p1600_p4, %p1599_p7 }
  0x5e   : > { %p1602_p6 = pnand %p1601_p13, %p1595_p0 }
  0x60   : > { %1605 = shalt.err (!%p1602_p6)
}
  0x61   : > { %1427 = dma.hbm_to_vmem [thread:$0]  (!%p1900_p2), %s1896_s14, 64, %s1904_s15, %s273_s12  }
  0x62   : > { %292 = sbr.rel (%p1803_p8) target bundleno = 2726 (0xaa6), region = 48  ;;  %s1934_s21 = sand.u32 (!%p1803_p8), 1, %s1676_s25  }
  0x63   : > { %s1257_s17 = sshll.u32 (!%p1803_p8), %s1934_s21, 2  ;;  %s295_s30 = scalar_lea.sflag (!%p1803_p8), [#allocation4], %s1934_s21 }
  0x64   : > { %s298_s8 = scalar_lea.vmem (!%p1803_p8), [#allocation3], %s1257_s17  ;;  %p2142_p7 = scmp.ne.s32.totalorder (!%p1803_p8), %s2135_s11, 0 }
  0x69   : > { %1659 = dma.done.wait (%p2142_p7), %s295_s30, 64  }
  0x6a   : > { %1661 = vsyncadd (%p2142_p7), %s295_s30, 4294967232  ;;  %p2143_p12 = scmp.ne.s32.totalorder %s2133_s9, 0 }
  0x6c   : > { %1663 = dma.done.wait (%p2143_p12), [#allocation7], 512  }
  0x6d   : > { %1665 = vsyncadd (%p2143_p12), [#allocation7], 4294966784  ;;  %v1699_v0 = vmov 0.0   ;;  %vm1700_vm0 = vmmov 0   ;;  %v1499_v1 = vld [vmem:[#allocation8] sm:$0xff]   ;;  %v1500_v2 = vld [vmem:[#allocation8 + $0x8] sm:$0xff]  }
  0x6e   : > { %1317 = vmatprep.subr.bf16.mxu0 %v1699_v0  ;;  %1321 = vmatprep.mubr.msk.bf16.mxu0 %vm1700_vm0, %v1699_v0  ;;  %v1501_v3 = vld [vmem:[#allocation6] sm:$0xff]   ;;  %v1502_v4 = vld [vmem:[#allocation6 + $0x8] sm:$0xff]   ;;  %v342_v5 = vld [vmem:[%s298_s8] sm:$0xf]  ;;  %vm366_vm1 = vcmask 261120   ;;  %vm411_vm2 = vcmask 519168  }
  0x6f   : > { %1325 = vmatprep.subr.bf16.mxu1 %v1699_v0  ;;  %1329 = vmatprep.mubr.msk.bf16.mxu1 %vm1700_vm0, %v1699_v0  ;;  %v418_v6 = vld [vmem:[%s298_s8] sm:$0xf]  ;;  %v1261_v7 = vld [vmem:[%s2122_s4] ss:$0 sm:$0xff]  ;;  %vm492_vm3 = vcmask 64512   ;;  %s1701_s15 = smov 120  }
  0x70   : > { %1318 = vmatpush3.bf16.msra.mxu0 %v1499_v1  ;;  %1326 = vmatpush3.bf16.msra.mxu1 %v1501_v3  ;;  %v1265_v18 = vld [vmem:[%s2120_s2] ss:$0 sm:$0xff]  ;;  %s1702_s24 = smov 96   ;;  %vm559_vm4 = vcmask 1043456   ;;  %s1703_s12 = smov 88  }
  0x71   : > { %1319 = vmatprep.subr.bf16.mxu0 %v1699_v0  ;;  %1327 = vmatprep.subr.bf16.mxu1 %v1699_v0  ;;  %s1704_s23 = smov 112   ;;  %v488_v53 = vld [vmem:[%s2123_s5 + $0x4] sm:$0xf]  ;;  %v487_v59 = vld [vmem:[%s2123_s5] sm:$0xf]  ;;  %s1705_s30 = smov 80  }
  0x72   : > { %v720_v54 = vsel %vm559_vm4, %v488_v53, 0  ;;  %v766_v62 = vsel %vm559_vm4, %v487_v59, 0  ;;  %s1706_s8 = smov 104   ;;  %s1707_s13 = smov 72  }
  0x73   : > { %s1284_s10 = sshll.u32 %s1684_s27, 7  ;;  %s1134_s27 = scalar_lea.sflag [#allocation5], %s1934_s21 }
  0x74   : > { %1320 = vmatpush3.bf16.msra.mxu0 %v1500_v2  ;;  %1328 = vmatpush3.bf16.msra.mxu1 %v1502_v4  ;;  %p2144_p2 = scmp.ne.s32.totalorder %s2140_s16, 0  ;;  %s1708_s11 = smov [#allocation9]  }
  0x75   : > { %1333 = vmatprep.subr.bf16.mxu0 %v1699_v0  ;;  %1339 = vmatprep.subr.bf16.mxu1 %v1699_v0 }
  0x77   : > { %1322 = vmatmul.mubr.msk.bf16.vlgmr.msra.gmra.mrb[0].mxu0 %vm366_vm1, %v342_v5  ;;  %1330 = vmatmul.mubr.msk.bf16.vlgmr.msra.gmra.mrb[0].mxu1 %vm366_vm1, %v418_v6 }
  0x78   : > { %1335 = vmatprep.mubr.msk.bf16.mxu0 %vm1700_vm0, %v1699_v0  ;;  %1341 = vmatprep.mubr.msk.bf16.mxu1 %vm1700_vm0, %v1699_v0 }
 0x14a   : > { %v404_v8 = vpop.f32.mrb[0].mxu0  ;;  %v480_v14 = vpop.f32.mrb[0].mxu1 }
 0x14b   : > { %v405_v9 = vadd.f32 %v1261_v7, %v404_v8  ;;  %v1323_v10 = vpop.f32.mrb[1].mxu0  ;;  %v1331_v15 = vpop.f32.mrb[1].mxu1  ;;  %v481_v22 = vadd.f32 %v1265_v18, %v480_v14 }
 0x14c   : > { %v407_v11 = vpop.f32.mrb[2].mxu0  ;;  %v483_v16 = vpop.f32.mrb[2].mxu1 }
 0x14d   : > { %v410_v12 = vpack.c.bf16 %v405_v9, %v405_v9  ;;  %v1324_v13 = vpop.f32.mrb[3].mxu0  ;;  %v1332_v17 = vpop.f32.mrb[3].mxu1  ;;  %v1973_v23 = vpack.c.bf16 %v481_v22, %v481_v22 }
 0x14f   : > { %412 = vst.msk [vmem:[#allocation2] sm:$0xf] %vm411_vm2, %v410_v12 }
 0x156   : > { %v491_v19 = vld [vmem:[#allocation2] sm:$0xf] }
 0x157   : > { %v497_v20 = vsel %vm492_vm3, %v491_v19, 0  ;;  %v1969_v21 = vcombine.low %v491_v19, %v491_v19 }
 0x158   : > { %1334 = vmatpush3.bf16.xpose.msra.mxu0 %v497_v20 }
 0x159   : > { %607 = vrot.lane.b32.xlu0 %v1969_v21, %s1701_s15  ;;  %1345 = vmatprep.subr.bf16.mxu0 %v1699_v0 }
 0x15d   : > { %605 = vrot.lane.b32.xlu0 %v1973_v23, %s1701_s15 }
 0x15f   : > { %1336 = vmatmul.mubr.msk.bf16.vlgmr.msra.gmra.mrb[4].mxu0 %vm492_vm3, %v1973_v23 }
 0x160   : > { %1347 = vmatprep.mubr.msk.bf16.mxu0 %vm1700_vm0, %v1699_v0 }
 0x1cb   : > { %v608_v24 = vpop.permute.xlu0 %607 }
 0x1cc   : > { %v613_v25 = vsel %vm492_vm3, %v608_v24, 0 }
 0x1cd   : > { %1346 = vmatpush3.bf16.xpose.msra.mxu0 %v613_v25 }
 0x1ce   : > { %1357 = vmatprep.subr.bf16.mxu0 %v1699_v0 }
 0x1cf   : > { %v606_v26 = vpop.permute.xlu0 %605 }
 0x1d4   : > { %1348 = vmatmul.mubr.msk.bf16.vlgmr.msra.gmra.mrb[8].mxu0 %vm492_vm3, %v606_v26 }
 0x1d5   : > { %1359 = vmatprep.mubr.msk.bf16.mxu0 %vm1700_vm0, %v1699_v0  ;;  %1358 = vmatpush3.bf16.msra.mxu0 %v720_v54 }
 0x1d6   : > { %1369 = vmatprep.subr.bf16.mxu0 %v1699_v0 }
 0x232   : > { %v533_v27 = vpop.f32.mrb[4].mxu0 }
 0x233   : > { %v1337_v28 = vpop.f32.mrb[5].mxu0  ;;  %v539_v29 = vsel %vm492_vm3, %v533_v27, -inf }
 0x234   : > { %540 = vmax.xlane.f32.xlu1 %v539_v29  ;;  %v536_v30 = vpop.f32.mrb[6].mxu0 }
 0x235   : > { %v1338_v31 = vpop.f32.mrb[7].mxu0 }
 0x2a7   : > { %v649_v32 = vpop.f32.mrb[8].mxu0 }
 0x2a8   : > { %v1349_v33 = vpop.f32.mrb[9].mxu0  ;;  %v655_v34 = vsel %vm492_vm3, %v649_v32, -inf }
 0x2a9   : > { %656 = vmax.xlane.f32.xlu1 %v655_v34  ;;  %v652_v35 = vpop.f32.mrb[10].mxu0 }
 0x2aa   : > { %v1350_v36 = vpop.f32.mrb[11].mxu0 }
 0x2ba   : > { %554 = vrot.lane.b32.xlu1 %v1969_v21, %s1702_s24  ;;  %s1260_s24 = sshll.u32 %s1934_s21, 3 }
 0x2bb   : > { %s336_s22 = scalar_lea.vmem [#allocation9], %s1260_s24 }
 0x2bc   : > { %s1148_s18 = sshll.u32 %s336_s22, 4  ;;  %s2070_s18 = int_to_ptr.vmem [resolvable:$true] %s1148_s18 }
 0x2bd   : > { %s1606_s9 = scalar_lea.vmem %s2070_s18, 128 }
 0x2be   : > { %p1607_p8 = scmp.ne.s32.totalorder %s2070_s18, %s1606_s9 }
 0x2c0   : > { %p1608_p1 = pnand %p1607_p8, %p2144_p2 }
 0x2c1   : > { %v541_v37 = vpop.xlane.xlu1 %540 }
 0x2c2   : > { %v542_v38 = vsub.f32 %v533_v27, %v541_v37  ;;  %p1609_p10 = pneg %p1608_p1 }
 0x2c4   : > { %v543_v39 = vmul.f32 1.442695, %v542_v38 }
 0x2c6   : > { %1504 = vpow2.f32 %v543_v39 }
 0x2d0   : > { %v1505_v40 = vpop.eup %1504 }
 0x2d1   : > { %v545_v41 = vsel %vm492_vm3, %v1505_v40, 0.0 }
 0x2d2   : > { %546 = vadd.xlane.f32.xlu0 %v545_v41 }
 0x336   : > { %v657_v42 = vpop.xlane.xlu1 %656 }
 0x337   : > { %v658_v43 = vsub.f32 %v649_v32, %v657_v42  ;;  %v489_v42 = vld [vmem:[%s2123_s5 + $0x8] sm:$0xf] }
 0x339   : > { %v659_v44 = vmul.f32 1.442695, %v658_v43  ;;  %v923_v43 = vsel %vm559_vm4, %v489_v42, 0 }
 0x33a   : > { %v555_v45 = vpop.permute.xlu1 %554 }
 0x33b   : > { %1506 = vpow2.f32 %v659_v44  ;;  %v561_v46 = vsel %vm559_vm4, %v555_v45, 0 }
 0x33c   : > { %1340 = vmatpush3.bf16.msra.mxu1 %v561_v46 }
 0x33d   : > { %1351 = vmatprep.subr.bf16.mxu1 %v1699_v0 }
 0x345   : > { %v1507_v47 = vpop.eup %1506 }
 0x346   : > { %v661_v48 = vsel %vm492_vm3, %v1507_v47, 0.0 }
 0x347   : > { %662 = vadd.xlane.f32.xlu1 %v661_v48 }
 0x358   : > { %667 = vrot.lane.b32.xlu1 %v1969_v21, %s1703_s12 }
 0x35c   : > { %810 = vrot.lane.b32.xlu1 %v1969_v21, %s1704_s23 }
 0x35f   : > { %v547_v49 = vpop.xlane.xlu0 %546 }
 0x360   : > { %1508 = vrcp.f32 %v547_v49  ;;  %808 = vrot.lane.b32.xlu1 %v1973_v23, %s1704_s23 }
 0x36a   : > { %v1509_v50 = vpop.eup %1508 }
 0x36b   : > { %v549_v51 = vmul.f32 %v1509_v50, %v1505_v40 }
 0x36d   : > { %v550_v52 = vpack.c.bf16 %v549_v51, %v549_v51 }
 0x36f   : > { %1342 = vmatmul.mubr.msk.bf16.vlgmr.msra.gmra.mrb[4].mxu1 %vm492_vm3, %v550_v52 }
 0x370   : > { %1353 = vmatprep.mubr.msk.bf16.mxu1 %vm1700_vm0, %v1699_v0 }
 0x3d4   : > { %v663_v55 = vpop.xlane.xlu1 %662 }
 0x3d5   : > { %1510 = vrcp.f32 %v663_v55 }
 0x3d8   : > { %v668_v56 = vpop.permute.xlu1 %667 }
 0x3d9   : > { %v673_v57 = vsel %vm559_vm4, %v668_v56, 0 }
 0x3da   : > { %1352 = vmatpush3.bf16.msra.mxu1 %v673_v57 }
 0x3db   : > { %1363 = vmatprep.subr.bf16.mxu1 %v1699_v0 }
 0x3dc   : > { %v811_v5 = vpop.permute.xlu1 %810 }
 0x3dd   : > { %v816_v10 = vsel %vm492_vm3, %v811_v5, 0 }
 0x3df   : > { %v1511_v58 = vpop.eup %1510 }
 0x3e0   : > { %v665_v60 = vmul.f32 %v1511_v58, %v1507_v47  ;;  %v809_v12 = vpop.permute.xlu1 %808 }
 0x3e2   : > { %v666_v61 = vpack.c.bf16 %v665_v60, %v665_v60 }
 0x3e4   : > { %1354 = vmatmul.mubr.msk.bf16.vlgmr.msra.gmra.mrb[8].mxu1 %vm492_vm3, %v666_v61 }
 0x3e5   : > { %1364 = vmatpush3.bf16.msra.mxu1 %v766_v62  ;;  %1365 = vmatprep.mubr.msk.bf16.mxu1 %vm1700_vm0, %v1699_v0 }
 0x3e6   : > { %1375 = vmatprep.subr.bf16.mxu1 %v1699_v0 }
 0x442   : > { %v597_v63 = vpop.f32.mrb[4].mxu1 }
 0x443   : > { %v603_v1 = vpack.c.bf16 %v597_v63, %v597_v63  ;;  %v1343_v2 = vpop.f32.mrb[5].mxu1 }
 0x444   : > { %v600_v3 = vpop.f32.mrb[6].mxu1 }
 0x445   : > { %v1344_v4 = vpop.f32.mrb[7].mxu1  ;;  %1366 = vmatmul.mubr.msk.bf16.vlgmr.msra.gmra.mrb[12].mxu1 %vm492_vm3, %v603_v1 }
 0x446   : > { %1377 = vmatprep.mubr.msk.bf16.mxu1 %vm1700_vm0, %v1699_v0 }
 0x4b7   : > { %v709_v6 = vpop.f32.mrb[8].mxu1 }
 0x4b8   : > { %v715_v7 = vpack.c.bf16 %v709_v6, %v709_v6  ;;  %v1355_v8 = vpop.f32.mrb[9].mxu1 }
 0x4b9   : > { %v712_v9 = vpop.f32.mrb[10].mxu1 }
 0x4ba   : > { %v1356_v11 = vpop.f32.mrb[11].mxu1  ;;  %1360 = vmatmul.mubr.msk.bf16.vlgmr.msra.gmra.mrb[12].mxu0 %vm492_vm3, %v715_v7 }
 0x4bb   : > { %1370 = vmatpush3.bf16.xpose.msra.mxu0 %v816_v10  ;;  %1371 = vmatprep.mubr.msk.bf16.mxu0 %vm1700_vm0, %v1699_v0 }
 0x4bc   : > { %1381 = vmatprep.subr.bf16.mxu0 %v1699_v0 }
 0x4c2   : > { %1372 = vmatmul.mubr.msk.bf16.vlgmr.msra.gmra.mrb[16].mxu0 %vm492_vm3, %v809_v12 }
 0x4c3   : > { %1383 = vmatprep.mubr.msk.bf16.mxu0 %vm1700_vm0, %v1699_v0  ;;  %1382 = vmatpush3.bf16.msra.mxu0 %v923_v43 }
 0x4c4   : > { %1393 = vmatprep.subr.bf16.mxu0 %v1699_v0 }
 0x518   : > { %v802_v13 = vpop.f32.mrb[12].mxu1 }
 0x519   : > { %v1367_v14 = vpop.f32.mrb[13].mxu1 }
 0x51a   : > { %v805_v15 = vpop.f32.mrb[14].mxu1 }
 0x51b   : > { %v1368_v16 = vpop.f32.mrb[15].mxu1 }
 0x58d   : > { %v756_v17 = vpop.f32.mrb[12].mxu0 }
 0x58e   : > { %v2024_v18 = vadd.f32 %v802_v13, %v756_v17  ;;  %v1361_v19 = vpop.f32.mrb[13].mxu0  ;;  %v1282_v13 = vld [vmem:[%s2124_s6] ss:$0 sm:$0xff] }
 0x58f   : > { %v759_v20 = vpop.f32.mrb[14].mxu0 }
 0x590   : > { %v1362_v22 = vpop.f32.mrb[15].mxu0 }
 0x595   : > { %v852_v24 = vpop.f32.mrb[16].mxu0 }
 0x596   : > { %v1373_v25 = vpop.f32.mrb[17].mxu0  ;;  %v858_v26 = vsel %vm492_vm3, %v852_v24, -inf }
 0x597   : > { %859 = vmax.xlane.f32.xlu0 %v858_v26  ;;  %v855_v27 = vpop.f32.mrb[18].mxu0 }
 0x598   : > { %v1374_v28 = vpop.f32.mrb[19].mxu0 }
 0x5ad   : > { %870 = vrot.lane.b32.xlu0 %v1969_v21, %s1705_s30 }
 0x5b1   : > { %968 = vrot.lane.b32.xlu0 %v1969_v21, %s1706_s8 }
 0x5b5   : > { %966 = vrot.lane.b32.xlu0 %v1973_v23, %s1706_s8  ;;  %s2068_s8 = scalar_lea.hbm %s2125_s7, %s1284_s10 }
 0x624   : > { %v860_v29 = vpop.xlane.xlu0 %859 }
 0x625   : > { %v861_v30 = vsub.f32 %v852_v24, %v860_v29 }
 0x627   : > { %v862_v31 = vmul.f32 1.442695, %v861_v30 }
 0x628   : > { %v871_v32 = vpop.permute.xlu0 %870 }
 0x629   : > { %1512 = vpow2.f32 %v862_v31  ;;  %v876_v33 = vsel %vm559_vm4, %v871_v32, 0 }
 0x62a   : > { %1376 = vmatpush3.bf16.msra.mxu1 %v876_v33 }
 0x62b   : > { %1387 = vmatprep.subr.bf16.mxu1 %v1699_v0 }
 0x62c   : > { %v969_v39 = vpop.permute.xlu0 %968 }
 0x62d   : > { %v974_v40 = vsel %vm492_vm3, %v969_v39, 0 }
 0x630   : > { %v967_v41 = vpop.permute.xlu0 %966 }
 0x633   : > { %v1513_v34 = vpop.eup %1512 }
 0x634   : > { %v864_v35 = vsel %vm492_vm3, %v1513_v34, 0.0 }
 0x635   : > { %865 = vadd.xlane.f32.xlu1 %v864_v35 }
 0x6c2   : > { %v866_v36 = vpop.xlane.xlu1 %865 }
 0x6c3   : > { %1514 = vrcp.f32 %v866_v36 }
 0x6cd   : > { %v1515_v37 = vpop.eup %1514 }
 0x6ce   : > { %v868_v38 = vmul.f32 %v1515_v37, %v1513_v34 }
 0x6d0   : > { %v869_v23 = vpack.c.bf16 %v868_v38, %v868_v38 }
 0x6d2   : > { %1378 = vmatmul.mubr.msk.bf16.vlgmr.msra.gmra.mrb[16].mxu1 %vm492_vm3, %v869_v23 }
 0x6d3   : > { %1388 = vmatpush3.bf16.xpose.msra.mxu1 %v974_v40  ;;  %1389 = vmatprep.mubr.msk.bf16.mxu1 %vm1700_vm0, %v1699_v0 }
 0x6d4   : > { %1399 = vmatprep.subr.bf16.mxu1 %v1699_v0 }
 0x6da   : > { %1390 = vmatmul.mubr.msk.bf16.vlgmr.msra.gmra.mrb[20].mxu1 %vm492_vm3, %v967_v41 }
 0x6db   : > { %1401 = vmatprep.mubr.msk.bf16.mxu1 %vm1700_vm0, %v1699_v0 }
 0x7a5   : > { %v912_v44 = vpop.f32.mrb[16].mxu1 }
 0x7a6   : > { %v918_v45 = vpack.c.bf16 %v912_v44, %v912_v44  ;;  %v1379_v46 = vpop.f32.mrb[17].mxu1 }
 0x7a7   : > { %v915_v47 = vpop.f32.mrb[18].mxu1 }
 0x7a8   : > { %v1380_v48 = vpop.f32.mrb[19].mxu1  ;;  %1384 = vmatmul.mubr.msk.bf16.vlgmr.msra.gmra.mrb[20].mxu0 %vm492_vm3, %v918_v45 }
 0x7a9   : > { %1395 = vmatprep.mubr.msk.bf16.mxu0 %vm1700_vm0, %v1699_v0  ;;  %v490_v0 = vld [vmem:[%s2123_s5 + $0xc] sm:$0xf] }
 0x7aa   : > { %v1081_v59 = vsel %vm559_vm4, %v490_v0, 0 }
 0x7ab   : > { %1400 = vmatpush3.bf16.msra.mxu1 %v1081_v59 }
 0x7ad   : > { %v1010_v49 = vpop.f32.mrb[20].mxu1 }
 0x7ae   : > { %v1391_v50 = vpop.f32.mrb[21].mxu1  ;;  %v1016_v51 = vsel %vm492_vm3, %v1010_v49, -inf }
 0x7af   : > { %1017 = vmax.xlane.f32.xlu0 %v1016_v51  ;;  %v1013_v52 = vpop.f32.mrb[22].mxu1 }
 0x7b0   : > { %v1392_v53 = vpop.f32.mrb[23].mxu1 }
 0x83c   : > { %v1018_v54 = vpop.xlane.xlu0 %1017 }
 0x83d   : > { %v1019_v55 = vsub.f32 %v1010_v49, %v1018_v54 }
 0x83f   : > { %v1020_v56 = vmul.f32 1.442695, %v1019_v55 }
 0x841   : > { %1516 = vpow2.f32 %v1020_v56 }
 0x84b   : > { %v1517_v57 = vpop.eup %1516 }
 0x84c   : > { %v1022_v58 = vsel %vm492_vm3, %v1517_v57, 0.0 }
 0x84d   : > { %1023 = vadd.xlane.f32.xlu1 %v1022_v58 }
 0x85e   : > { %1028 = vrot.lane.b32.xlu1 %v1969_v21, %s1707_s13  ;;  %s1610_s13 = sshll.u32 %s1708_s11, 4  ;;  %s1611_s13 = int_to_ptr.vmem [resolvable:$false] %s1610_s13 }
 0x85f   : > { %s1612_s14 = scalar_lea.vmem %s1611_s13, 256  ;;  %p1613_p3 = scmp.lt.s32.totalorder %s2070_s18, %s1611_s13 }
 0x860   : > { %p1614_p5 = scmp.lt.s32.totalorder %s1612_s14, %s1606_s9 }
 0x862   : > { %p1615_p9 = por %p1614_p5, %p1613_p3 }
 0x864   : > { %p1616_p11 = pnand %p1615_p9, %p1609_p10 }
 0x87b   : > { %v959_v60 = vpop.f32.mrb[20].mxu0 }
 0x87c   : > { %v965_v61 = vadd.f32 %v959_v60, %v2024_v18  ;;  %v1385_v62 = vpop.f32.mrb[21].mxu0 }
 0x87d   : > { %v962_v63 = vpop.f32.mrb[22].mxu0 }
 0x87e   : > { %v1386_v1 = vpop.f32.mrb[23].mxu0 }
 0x8da   : > { %v1024_v2 = vpop.xlane.xlu1 %1023 }
 0x8db   : > { %1518 = vrcp.f32 %v1024_v2 }
 0x8de   : > { %v1029_v3 = vpop.permute.xlu1 %1028 }
 0x8df   : > { %v1034_v21 = vsel %vm559_vm4, %v1029_v3, 0 }
 0x8e0   : > { %1394 = vmatpush3.bf16.msra.mxu0 %v1034_v21 }
 0x8e5   : > { %v1519_v4 = vpop.eup %1518 }
 0x8e6   : > { %v1026_v5 = vmul.f32 %v1519_v4, %v1517_v57 }
 0x8e8   : > { %v1027_v6 = vpack.c.bf16 %v1026_v5, %v1026_v5 }
 0x8ea   : > { %1396 = vmatmul.mubr.msk.bf16.vlgmr.msra.gmra.mrb[24].mxu0 %vm492_vm3, %v1027_v6 }
 0x9bd   : > { %v1070_v7 = vpop.f32.mrb[24].mxu0 }
 0x9be   : > { %v1076_v8 = vpack.c.bf16 %v1070_v7, %v1070_v7  ;;  %v1397_v9 = vpop.f32.mrb[25].mxu0 }
 0x9bf   : > { %v1073_v10 = vpop.f32.mrb[26].mxu0 }
 0x9c0   : > { %v1398_v11 = vpop.f32.mrb[27].mxu0  ;;  %1402 = vmatmul.mubr.msk.bf16.vlgmr.msra.gmra.mrb[24].mxu1 %vm492_vm3, %v1076_v8 }
 0xa93   : > { %v1117_v12 = vpop.f32.mrb[24].mxu1 }
 0xa94   : > { %v1123_v14 = vadd.f32 %v1117_v12, %v965_v61  ;;  %v1403_v15 = vpop.f32.mrb[25].mxu1 }
 0xa95   : > { %v1120_v16 = vpop.f32.mrb[26].mxu1 }
 0xa96   : > { %v1131_v17 = vadd.f32 %v1282_v13, %v1123_v14  ;;  %v1404_v18 = vpop.f32.mrb[27].mxu1 }
 0xa98   : > { %1132 = vst.msk [vmem:[%s336_s22] sm:$0xff] %vm366_vm1, %v1131_v17 }
 0xa99   : > { %1619 = shalt.err (!%p1616_p11)
}
 0xa9a   : > { %s1620_s21 = scalar_lea.hbm %s2068_s8, 128  ;;  %s1624_s12 = scalar_lea.hbm %s2125_s7, 256 }
 0xa9b   : > { %p1621_p0 = scmp.ne.s32.totalorder %s2068_s8, %s1620_s21  ;;  %p1625_p6 = scmp.lt.u32.totalorder %s2068_s8, %s2125_s7 }
 0xa9c   : > { %p1626_p7 = scmp.lt.u32.totalorder %s1624_s12, %s1620_s21  ;;  %p1628_p8 = scmp.lt.u32.totalorder %s1620_s21, %s2068_s8 }
 0xa9d   : > { %p1622_p4 = pnand %p1621_p0, %p2144_p2 }
 0xa9e   : > { %p1627_p12 = por %p1626_p7, %p1625_p6 }
 0xa9f   : > { %p1623_p13 = pneg %p1622_p4 }
 0xaa0   : > { %p1629_p1 = por %p1628_p8, %p1627_p12 }
 0xaa2   : > { %p1630_p10 = pnand %p1629_p1, %p1623_p13 }
 0xaa4   : > { %1633 = shalt.err (!%p1630_p10)
}
 0xaa5   : > { %1415 = dma.vmem_to_hbm [thread:$0]  (%p2144_p2), %s2070_s18, 128, %s2068_s8, %s1134_s27  }
 0xaa6 PF: > { %s2145_s22 = sld [smem:[#allocation13_spill]]  ;;  %s2146_s17 = sld [smem:[#allocation14_spill]] }
 0xaa7   : > { %p2148_p5 = scmp.ge.s32.totalorder %s1692_s29, 2 }
 0xaac   : > { %s1160_s30 = sand.u32 1, %s2145_s22   ;;  %p2147_p3 = scmp.ne.s32.totalorder %s2146_s17, 0 }
 0xaad   : > { %s1161_s9 = scalar_lea.sflag [#allocation5], %s1160_s30 }
 0xaae   : > { %p1429_p9 = pnand %p2148_p5, %p2147_p3 }
 0xab0   : > { %1667 = dma.done.wait (!%p1429_p9), %s1161_s9, 128  }
 0xab1   : > { %1669 = vsyncadd (!%p1429_p9), %s1161_s9, 4294967168  ;;  %s24_s29 = sadd.s32 1, %s1692_s29   ;;  %s2149_s24 = smov %s1676_s25 }
 0xab2   : > { %p21_p11 = scmp.ge.s32.totalorder %s24_s29, 4   ;;  %s2150_s25 = smov %s1680_s26 }
 0xab3   : > { %s2151_s26 = smov %s1891_s19  ;;  %s2152_s27 = smov %s1688_s28 }
 0xab4   : > { %s2153_s28 = smov %s2155_s20  ;;  %23 = sbr.rel (!%p21_p11) target bundleno = 7 (0x7), region = 106 }
 0xabb   :  { %1166 = vsyncpa [#allocation4], 1 }
 0xabc   :  { %1168 = vsyncpa [#allocation4 + $0x1], 1 }
 0xabd   :  { %1169 = vsyncpa [#allocation7], 1 }
 0xabe   :  { %1170 = vsyncpa [#allocation5], 1 }
 0xabf   :  { %1172 = vsyncpa [#allocation5 + $0x1], 1 }

</bundles_post_ra>
